<compile_context>
chip_gen: v5e
topology: v5e:2x2
jax: 0.10.0
libtpu: 0.0.40
codegen_flags: <defaults>
</compile_context>

<pallas_src>
import functools

import jax
import jax.numpy as jnp
from jax.experimental import pallas as pl
from jax.experimental.pallas import tpu as pltpu


def _mlp_fusion_kernel(g_ref, h_ref, w1g_ref, w1h_ref, b1_ref, w2_ref, b2_ref,
                       o_ref):
    # g_ref, h_ref, o_ref: (TN, C) row tiles; weights/biases: full, VMEM-resident.
    g = g_ref[...].astype(jnp.float32)
    h = h_ref[...].astype(jnp.float32)

    # fc1: cat([g, h], -1) @ W1^T + b1  ==  g @ W1[:, :C]^T + h @ W1[:, C:]^T + b1
    hidden = jnp.dot(g, w1g_ref[...], preferred_element_type=jnp.float32)
    hidden = hidden + jnp.dot(h, w1h_ref[...], preferred_element_type=jnp.float32)
    hidden = hidden + b1_ref[...]
    hidden = jnp.maximum(hidden, 0.0)                       # ReLU

    # fc2: hidden @ W2^T + b2
    out = jnp.dot(hidden, w2_ref[...], preferred_element_type=jnp.float32)
    out = out + b2_ref[...]
    o_ref[...] = out.astype(o_ref.dtype)


def _round_up(x, m):
    return ((x + m - 1) // m) * m


def mlp_fusion(g_embed, h_embed, w1, b1, w2, b2, *, tile_rows=512):
    """g_embed, h_embed: [..., C]; w1: [C, 2C]; b1: [C]; w2: [C, C]; b2: [C]."""
    assert g_embed.shape == h_embed.shape
    C = g_embed.shape[-1]
    assert w1.shape == (C, 2 * C)
    assert b1.shape == (C,)
    assert w2.shape == (C, C)
    assert b2.shape == (C,)

    lead_shape = g_embed.shape[:-1]
    N = 1
    for d in lead_shape:
        N *= d

    g2 = g_embed.reshape(N, C)
    h2 = h_embed.reshape(N, C)

    # Hoist weight split + transpose out of the kernel (tiny one-time transform).
    w1g_t = w1[:, :C].T        # (C, C): first half of fc1, pre-transposed
    w1h_t = w1[:, C:].T        # (C, C): second half of fc1, pre-transposed
    w2_t = w2.T                # (C, C)
    b1_2 = b1.reshape(1, C)    # lane-dense row vectors
    b2_2 = b2.reshape(1, C)

    # Row tile: as large as possible (amortize per-step overhead) but capped so
    # the double-buffered activation footprint (g, h, out x 2 buffers, f32)
    # stays inside the conservative 16 MiB scoped-VMEM default on v5e
    # (also well within v6e/v7x budgets).
    bytes_per_row = 6 * 4 * C
    vmem_budget = 12 * 1024 * 1024
    max_tn = max(8, (vmem_budget // bytes_per_row) // 8 * 8)
    tn = min(tile_rows, max_tn, _round_up(N, 8))
    tn = max(8, tn - tn % 8)

    # No input padding: partial last block is masked (op is strictly row-local).
    grid = (pl.cdiv(N, tn),)

    cost = pl.CostEstimate(
        flops=6 * N * C * C,                 # 4C^2 (fc1) + 2C^2 (fc2) per row
        transcendentals=0,
        bytes_accessed=3 * N * C * 4 + (3 * C * C + 2 * C) * 4,
    )

    out = pl.pallas_call(
        _mlp_fusion_kernel,
        out_shape=jax.ShapeDtypeStruct((N, C), g_embed.dtype),
        grid_spec=pltpu.PrefetchScalarGridSpec(
            num_scalar_prefetch=0,
            grid=grid,
            in_specs=[
                pl.BlockSpec((tn, C), lambda i: (i, 0)),    # g row tile
                pl.BlockSpec((tn, C), lambda i: (i, 0)),    # h row tile
                pl.BlockSpec((C, C), lambda i: (0, 0)),     # W1[:, :C]^T (resident)
                pl.BlockSpec((C, C), lambda i: (0, 0)),     # W1[:, C:]^T (resident)
                pl.BlockSpec((1, C), lambda i: (0, 0)),     # b1
                pl.BlockSpec((C, C), lambda i: (0, 0)),     # W2^T (resident)
                pl.BlockSpec((1, C), lambda i: (0, 0)),     # b2
            ],
            out_specs=pl.BlockSpec((tn, C), lambda i: (i, 0)),
        ),
        compiler_params=pltpu.CompilerParams(
            dimension_semantics=("parallel",),
        ),
        cost_estimate=cost,
    )(g2, h2, w1g_t, w1h_t, b1_2, w2_t, b2_2)

    return out.reshape(*lead_shape, C)


def _linear_init(key, out_features, in_features):
    # Mimics torch.nn.Linear default init: U(-1/sqrt(fan_in), 1/sqrt(fan_in)).
    kw, kb = jax.random.split(key)
    bound = 1.0 / (in_features ** 0.5)
    w = jax.random.uniform(kw, (out_features, in_features), jnp.float32,
                           -bound, bound)
    b = jax.random.uniform(kb, (out_features,), jnp.float32, -bound, bound)
    return w, b


def _reference(g, h, w1, b1, w2, b2):
    concat = jnp.concatenate([g, h], axis=-1)
    hidden = jax.nn.relu(concat @ w1.T + b1)
    return hidden @ w2.T + b2


if __name__ == "__main__":
    key = jax.random.PRNGKey(0)
    k_g, k_h, k_fc1, k_fc2 = jax.random.split(key, 4)

    batch, seq, in_channels = 2, 8, 32
    g_embed = jax.random.normal(k_g, (batch, seq, in_channels), jnp.float32)
    h_embed = jax.random.normal(k_h, (batch, seq, in_channels), jnp.float32)

    w1, b1 = _linear_init(k_fc1, in_channels, 2 * in_channels)   # fc1
    w2, b2 = _linear_init(k_fc2, in_channels, in_channels)       # fc2

    out = mlp_fusion(g_embed, h_embed, w1, b1, w2, b2)
    out = jax.block_until_ready(out)

    ref = _reference(g_embed, h_embed, w1, b1, w2, b2)
    assert out.shape == ref.shape
    assert jnp.allclose(out, ref, atol=1e-4, rtol=1e-4), "mismatch vs reference"

    print("KERNEL_OK")
</pallas_src>

<mosaic_0001>
module attributes {stable_mosaic.version = 11 : i64} {
  func.func @_mlp_fusion_kernel(%arg0: i32, %arg1: memref<16x32xf32, #tpu.memory_space<vmem>>, %arg2: memref<16x32xf32, #tpu.memory_space<vmem>>, %arg3: memref<32x32xf32, #tpu.memory_space<vmem>>, %arg4: memref<32x32xf32, #tpu.memory_space<vmem>>, %arg5: memref<1x32xf32, #tpu.memory_space<vmem>>, %arg6: memref<32x32xf32, #tpu.memory_space<vmem>>, %arg7: memref<1x32xf32, #tpu.memory_space<vmem>>, %arg8: memref<16x32xf32, #tpu.memory_space<vmem>>) attributes {dimension_semantics = [#tpu.dimension_semantics<parallel>], iteration_bounds = array<i64: 1>, scalar_prefetch = 0 : i64, scratch_operands = 0 : i64, tpu.core_type = #tpu.core_type<tc>, window_params = [{transform_indices = @transform_0, window_bounds = array<i64: 16, 32>}, {transform_indices = @transform_1, window_bounds = array<i64: 16, 32>}, {pipeline_mode = #tpu.pipeline_mode<synchronous>, transform_indices = @transform_2, window_bounds = array<i64: 32, 32>}, {pipeline_mode = #tpu.pipeline_mode<synchronous>, transform_indices = @transform_3, window_bounds = array<i64: 32, 32>}, {pipeline_mode = #tpu.pipeline_mode<synchronous>, transform_indices = @transform_4, window_bounds = array<i64: 1, 32>}, {pipeline_mode = #tpu.pipeline_mode<synchronous>, transform_indices = @transform_5, window_bounds = array<i64: 32, 32>}, {pipeline_mode = #tpu.pipeline_mode<synchronous>, transform_indices = @transform_6, window_bounds = array<i64: 1, 32>}, {transform_indices = @transform_7, window_bounds = array<i64: 16, 32>}]} {
    %c0 = arith.constant 0 : index
    %c0_0 = arith.constant 0 : index
    %0 = vector.load %arg1[%c0, %c0_0] : memref<16x32xf32, #tpu.memory_space<vmem>>, vector<16x32xf32>
    %c0_1 = arith.constant 0 : index
    %c0_2 = arith.constant 0 : index
    %1 = vector.load %arg2[%c0_1, %c0_2] : memref<16x32xf32, #tpu.memory_space<vmem>>, vector<16x32xf32>
    %c0_3 = arith.constant 0 : index
    %c0_4 = arith.constant 0 : index
    %2 = vector.load %arg3[%c0_3, %c0_4] : memref<32x32xf32, #tpu.memory_space<vmem>>, vector<32x32xf32>
    %cst = arith.constant dense<0.000000e+00> : vector<16x32xf32>
    %3 = tpu.matmul %0, %2, %cst {dimension_numbers = #tpu.dot_dimension_numbers<[1], [0], [0], [1], [0, 0, 1, 1], [], []>} : vector<16x32xf32>, vector<32x32xf32>, vector<16x32xf32> -> vector<16x32xf32>
    %c0_5 = arith.constant 0 : index
    %c0_6 = arith.constant 0 : index
    %4 = vector.load %arg4[%c0_5, %c0_6] : memref<32x32xf32, #tpu.memory_space<vmem>>, vector<32x32xf32>
    %cst_7 = arith.constant dense<0.000000e+00> : vector<16x32xf32>
    %5 = tpu.matmul %1, %4, %cst_7 {dimension_numbers = #tpu.dot_dimension_numbers<[1], [0], [0], [1], [0, 0, 1, 1], [], []>} : vector<16x32xf32>, vector<32x32xf32>, vector<16x32xf32> -> vector<16x32xf32>
    %6 = arith.addf %3, %5 : vector<16x32xf32>
    %c0_8 = arith.constant 0 : index
    %c0_9 = arith.constant 0 : index
    %7 = vector.load %arg5[%c0_8, %c0_9] : memref<1x32xf32, #tpu.memory_space<vmem>>, vector<1x32xf32>
    %8 = vector.broadcast %7 : vector<1x32xf32> to vector<16x32xf32>
    %9 = arith.addf %6, %8 : vector<16x32xf32>
    %cst_10 = arith.constant 0.000000e+00 : f32
    %10 = vector.broadcast %cst_10 : f32 to vector<16x32xf32>
    %11 = arith.maximumf %9, %10 : vector<16x32xf32>
    %c0_11 = arith.constant 0 : index
    %c0_12 = arith.constant 0 : index
    %12 = vector.load %arg6[%c0_11, %c0_12] : memref<32x32xf32, #tpu.memory_space<vmem>>, vector<32x32xf32>
    %cst_13 = arith.constant dense<0.000000e+00> : vector<16x32xf32>
    %13 = tpu.matmul %11, %12, %cst_13 {dimension_numbers = #tpu.dot_dimension_numbers<[1], [0], [0], [1], [0, 0, 1, 1], [], []>} : vector<16x32xf32>, vector<32x32xf32>, vector<16x32xf32> -> vector<16x32xf32>
    %c0_14 = arith.constant 0 : index
    %c0_15 = arith.constant 0 : index
    %14 = vector.load %arg7[%c0_14, %c0_15] : memref<1x32xf32, #tpu.memory_space<vmem>>, vector<1x32xf32>
    %15 = vector.broadcast %14 : vector<1x32xf32> to vector<16x32xf32>
    %16 = arith.addf %13, %15 : vector<16x32xf32>
    %c0_16 = arith.constant 0 : index
    %c0_17 = arith.constant 0 : index
    %17 = vector.load %arg8[%c0_16, %c0_17] : memref<16x32xf32, #tpu.memory_space<vmem>>, vector<16x32xf32>
    tpu.vector_store %arg8[%c0_16, %c0_17], %16 {strides = array<i32>} : memref<16x32xf32, #tpu.memory_space<vmem>>, vector<16x32xf32>,
    return
  }
  func.func @transform_0(%arg0: i32) -> (i32, i32) {
    %c0_i32 = arith.constant 0 : i32
    %c0_i32_0 = arith.constant 0 : i32
    return %arg0, %c0_i32 : i32, i32
  }
  func.func @transform_1(%arg0: i32) -> (i32, i32) {
    %c0_i32 = arith.constant 0 : i32
    %c0_i32_0 = arith.constant 0 : i32
    return %arg0, %c0_i32 : i32, i32
  }
  func.func @transform_2(%arg0: i32) -> (i32, i32) {
    %c0_i32 = arith.constant 0 : i32
    %c0_i32_0 = arith.constant 0 : i32
    %c0_i32_1 = arith.constant 0 : i32
    return %c0_i32, %c0_i32_0 : i32, i32
  }
  func.func @transform_3(%arg0: i32) -> (i32, i32) {
    %c0_i32 = arith.constant 0 : i32
    %c0_i32_0 = arith.constant 0 : i32
    %c0_i32_1 = arith.constant 0 : i32
    return %c0_i32, %c0_i32_0 : i32, i32
  }
  func.func @transform_4(%arg0: i32) -> (i32, i32) {
    %c0_i32 = arith.constant 0 : i32
    %c0_i32_0 = arith.constant 0 : i32
    %c0_i32_1 = arith.constant 0 : i32
    return %c0_i32, %c0_i32_0 : i32, i32
  }
  func.func @transform_5(%arg0: i32) -> (i32, i32) {
    %c0_i32 = arith.constant 0 : i32
    %c0_i32_0 = arith.constant 0 : i32
    %c0_i32_1 = arith.constant 0 : i32
    return %c0_i32, %c0_i32_0 : i32, i32
  }
  func.func @transform_6(%arg0: i32) -> (i32, i32) {
    %c0_i32 = arith.constant 0 : i32
    %c0_i32_0 = arith.constant 0 : i32
    %c0_i32_1 = arith.constant 0 : i32
    return %c0_i32, %c0_i32_0 : i32, i32
  }
  func.func @transform_7(%arg0: i32) -> (i32, i32) {
    %c0_i32 = arith.constant 0 : i32
    %c0_i32_0 = arith.constant 0 : i32
    return %arg0, %c0_i32 : i32, i32
  }
}

</mosaic_0001>

<bundles_post_ra>
// kernel: tpu_custom_call.1
= control target key start
LH: loop header
LB: loop body
LE: loop exit
PB: predicated region body
PF: predicated region fallthrough
CT: control target
= control target key end

     0   :  { %12 = vsyncpa [#allocation3], 0  ;;  %s514_s0 = inlined_call_operand.hbm [shape: f32[16,32], index: 0, kind: input, shape index: {}]   ;;  %s515_s1 = inlined_call_operand.hbm [shape: f32[16,32], index: 1, kind: input, shape index: {}]   ;;  %s516_s2 = inlined_call_operand.hbm [shape: f32[32,32], index: 2, kind: input, shape index: {}]   ;;  %s517_s3 = inlined_call_operand.hbm [shape: f32[32,32], index: 3, kind: input, shape index: {}]   ;;  %s518_s4 = inlined_call_operand.vmem [shape: f32[1,32], index: 4, kind: input, shape index: {}]   ;;  %s519_s5 = inlined_call_operand.hbm [shape: f32[32,32], index: 5, kind: input, shape index: {}]   ;;  %s520_s6 = inlined_call_operand.vmem [shape: f32[1,32], index: 6, kind: input, shape index: {}]   ;;  %s521_s7 = inlined_call_operand.hbm [shape: f32[16,32], index: 7, kind: output, shape index: {}]  }
   0x1   :  { %13 = vsyncpa [#allocation6], 0 }
   0x2   :  { %14 = vsyncpa [#allocation9], 0 }
   0x3   :  { %15 = vsyncpa [#allocation4], 0  ;;  %s33_s26 = sshll.u32 %s515_s1, 4  ;;  %s416_s27 = smov [#allocation5]   ;;  %s34_s26 = int_to_ptr.hbm [resolvable:$true] %s33_s26 }
   0x4   :  { %s35_s28 = sshll.u32 %s416_s27, 4  ;;  %s59_s8 = sshll.u32 %s517_s3, 4  ;;  %s36_s28 = int_to_ptr.vmem [resolvable:$true] %s35_s28  ;;  %s60_s8 = int_to_ptr.hbm [resolvable:$true] %s59_s8 }
   0x5   :  { %s417_s9 = smov 128   ;;  %s418_s10 = smov 8  }
   0x6   :  { %41 = dma.hbm_to_vmem [thread:$0]  %s34_s26, 256, %s36_s28, [#allocation6], %s417_s9, %s417_s9, %s418_s10  }
   0x7   :  { %s419_s11 = smov [#allocation8]   ;;  %s20_s1 = sshll.u32 %s514_s0, 4  ;;  %s21_s1 = int_to_ptr.hbm [resolvable:$true] %s20_s1 }
   0x8   :  { %s61_s12 = sshll.u32 %s419_s11, 4  ;;  %s46_s16 = sshll.u32 %s516_s2, 4  ;;  %s62_s12 = int_to_ptr.vmem [resolvable:$true] %s61_s12  ;;  %s47_s16 = int_to_ptr.hbm [resolvable:$true] %s46_s16 }
   0x9   :  { %67 = dma.hbm_to_vmem [thread:$0]  %s60_s8, 512, %s62_s12, [#allocation9], %s417_s9, %s417_s9, %s418_s10  }
   0xa   :  { %s420_s17 = smov [#allocation2]   ;;  %s421_s19 = smov [#allocation7]  }
   0xb   :  { %s22_s18 = sshll.u32 %s420_s17, 4  ;;  %s48_s0 = sshll.u32 %s421_s19, 4  ;;  %s23_s18 = int_to_ptr.vmem [resolvable:$true] %s22_s18  ;;  %s49_s0 = int_to_ptr.vmem [resolvable:$true] %s48_s0 }
   0xc   :  { %28 = dma.hbm_to_vmem [thread:$0]  %s21_s1, 256, %s23_s18, [#allocation3], %s417_s9, %s417_s9, %s418_s10  }
   0xd   :  { %s74_s22 = sshll.u32 %s519_s5, 4  ;;  %s422_s2 = smov [#allocation10]   ;;  %s75_s22 = int_to_ptr.hbm [resolvable:$true] %s74_s22 }
   0xe   :  { %54 = dma.hbm_to_vmem [thread:$0]  %s47_s16, 512, %s49_s0, [#allocation6], %s417_s9, %s417_s9, %s418_s10  }
   0xf   :  { %s76_s23 = sshll.u32 %s422_s2, 4  ;;  %s77_s23 = int_to_ptr.vmem [resolvable:$true] %s76_s23 }
  0x10   :  { %82 = dma.hbm_to_vmem [thread:$0]  %s75_s22, 512, %s77_s23, [#allocation9], %s417_s9, %s417_s9, %s418_s10  }
  0x11   :  { %408 = dma.done.wait [#allocation3], 256  }
  0x12   :  { %409 = vsyncadd [#allocation3], 4294967040 }
  0x13   :  { %410 = dma.done.wait [#allocation6], 768  }
  0x14   :  { %411 = vsyncadd [#allocation6], 4294966528 }
  0x15   :  { %412 = dma.done.wait [#allocation9], 1024  }
  0x16   :  { %413 = vsyncadd [#allocation9], 4294966272  ;;  %v116_v0 = vld [vmem:[#allocation8 + $0x18] sm:$0xff]  ;;  %v115_v2 = vld [vmem:[#allocation8 + $0x10] sm:$0xff]  ;;  %vm117_vm0 = vcmask 261120   ;;  %s229_s30 = sshll.u32 %s521_s7, 4  ;;  %s230_s30 = int_to_ptr.hbm [resolvable:$true] %s229_s30 }
  0x17   :  { %v112_v1 = vld [vmem:[#allocation7 + $0x18] sm:$0xff]  ;;  %136 = vmatpush.msra.mxu0 %v116_v0  ;;  %v111_v3 = vld [vmem:[#allocation7 + $0x10] sm:$0xff]  ;;  %250 = vmatpush.msra.mxu3 %v116_v0  ;;  %v114_v4 = vld [vmem:[#allocation8 + $0x8] sm:$0xff] }
  0x18   :  { %165 = vmatpush.msra.mxu1 %v112_v1  ;;  %v110_v5 = vld [vmem:[#allocation7 + $0x8] sm:$0xff]  ;;  %v113_v6 = vld [vmem:[#allocation8] sm:$0xff]  ;;  %v107_v8 = vld [vmem:[#allocation5] sm:$0xff] }
  0x19   :  { %137 = vmatpush.msra.mxu0 %v115_v2  ;;  %251 = vmatpush.msra.mxu3 %v115_v2  ;;  %v109_v7 = vld [vmem:[#allocation7] sm:$0xff]  ;;  %v108_v10 = vld [vmem:[#allocation5 + $0x8] sm:$0xff]  ;;  %v106_v11 = vld [vmem:[#allocation2 + $0x8] sm:$0xff] }
  0x1a   :  { %166 = vmatpush.msra.mxu1 %v111_v3  ;;  %v105_v9 = vld [vmem:[#allocation2] sm:$0xff]  ;;  %v187_v12 = vld [vmem:[#allocation10 + $0x18] sm:$0xff]  ;;  %v186_v13 = vld [vmem:[#allocation10 + $0x10] sm:$0xff] }
  0x1b   :  { %138 = vmatpush.msra.mxu0 %v114_v4  ;;  %252 = vmatpush.msra.mxu3 %v114_v4  ;;  %v185_v14 = vld [vmem:[#allocation10 + $0x8] sm:$0xff]  ;;  %v184_v15 = vld [vmem:[#allocation10] sm:$0xff] }
  0x1c   :  { %167 = vmatpush.msra.mxu1 %v110_v5  ;;  %210 = vmatpush.msra.mxu2 %v187_v12  ;;  %v262_v16 = vld [vmem:[%s518_s4] ss:$0 sm:$0xff]  ;;  %s423_s4 = smov [#allocation11]  }
  0x1d   :  { %139 = vmatpush.msra.mxu0 %v113_v6  ;;  %253 = vmatpush.msra.mxu3 %v113_v6  ;;  %v263_v27 = vld [vmem:[%s520_s6] ss:$0 sm:$0xff]  ;;  %s227_s27 = sshll.u32 %s423_s4, 4  ;;  %s228_s27 = int_to_ptr.vmem [resolvable:$true] %s227_s27 }
  0x1e   :  { %168 = vmatpush.msra.mxu1 %v109_v7  ;;  %244 = vmatmul.msk.f32.vlgmr.msra.gmra.mxu0 %vm117_vm0, %v107_v8 }
  0x1f   :  { %246 = vmatmul.msk.f32.vlgmr.msra.gmra.mxu1 %vm117_vm0, %v105_v9  ;;  %245 = vmatmul.msk.f32.vlgmr.msra.gmra.mxu3 %vm117_vm0, %v108_v10 }
  0x20   :  { %211 = vmatpush.msra.mxu2 %v186_v13 }
  0x22   :  { %212 = vmatpush.msra.mxu2 %v185_v14 }
  0x24   :  { %213 = vmatpush.msra.mxu2 %v184_v15 }
  0x27   :  { %247 = vmatmul.msk.f32.gmra.mxu1 %vm117_vm0, %v106_v11 }
  0x9b   :  { %v141_v17 = vpop.f32.mrf.mxu0 }
  0x9c   :  { %v170_v18 = vpop.f32.mrf.mxu1 }
  0x9d   :  { %v171_v19 = vadd.f32 %v170_v18, %v141_v17 }
  0x9f   :  { %v180_v20 = vadd.f32 %v262_v16, %v171_v19 }
  0xa1   :  { %v182_v21 = vmax.f32 %v180_v20, 0.0 }
  0xa2   :  { %v144_v22 = vpop.f32.mrf.mxu3 }
  0xa3   :  { %248 = vmatmul.msk.f32.vlgmr.msra.gmra.mxu2 %vm117_vm0, %v182_v21 }
  0xa4   :  { %v173_v23 = vpop.f32.mrf.mxu1 }
  0xa5   :  { %v174_v24 = vadd.f32 %v173_v23, %v144_v22 }
  0xa7   :  { %v181_v25 = vadd.f32 %v262_v16, %v174_v24 }
  0xa9   :  { %v183_v26 = vmax.f32 %v181_v25, 0.0 }
  0xab   :  { %249 = vmatmul.msk.f32.gmra.mxu2 %vm117_vm0, %v183_v26 }
 0x126   :  { %v215_v28 = vpop.f32.mrf.mxu2 }
 0x127   :  { %v216_v29 = vadd.f32 %v263_v27, %v215_v28 }
 0x129   :  { %221 = vst.msk [vmem:[#allocation11] sm:$0xff] %vm117_vm0, %v216_v29 }
 0x12e   :  { %v218_v30 = vpop.f32.mrf.mxu2 }
 0x12f   :  { %v219_v31 = vadd.f32 %v263_v27, %v218_v30 }
 0x131   :  { %222 = vst.msk [vmem:[#allocation11 + $0x8] sm:$0xff] %vm117_vm0, %v219_v31 }
 0x132   :  { %235 = dma.vmem_to_hbm [thread:$0]  %s228_s27, 256, %s230_s30, [#allocation4], %s417_s9, %s417_s9, %s418_s10  }
 0x133   :  { %414 = dma.done.wait [#allocation4], 256  }
 0x134   :  { %415 = vsyncadd [#allocation4], 4294967040 }
 0x135   :  { %240 = vsyncpa [#allocation3], 1 }
 0x136   :  { %241 = vsyncpa [#allocation6], 1 }
 0x137   :  { %242 = vsyncpa [#allocation9], 1 }
 0x138   :  { %243 = vsyncpa [#allocation4], 1 }

</bundles_post_ra>
